<compile_context>
chip_gen: v7x
topology: tpu7x:2x2x1
jax: 0.10.0
libtpu: 0.0.40
codegen_flags: <defaults>
</compile_context>

<pallas_src>
import math

import jax
import jax.numpy as jnp
from jax.experimental import pallas as pl
from jax.experimental.pallas import tpu as pltpu


def _round_up(v, m):
    return ((v + m - 1) // m) * m


# --------------------------------------------------------------------------
# Stage 1: hidden = x @ W_t + b   (weight pre-transposed in the wrapper)
# --------------------------------------------------------------------------
def linear_kernel(x_ref, wt_ref, b_ref, h_ref):
    h_ref[...] = (
        jnp.dot(x_ref[...], wt_ref[...], preferred_element_type=jnp.float32)
        + b_ref[...]
    ).astype(h_ref.dtype)


# --------------------------------------------------------------------------
# Stage 2: out = relu(adj @ hidden)   (tiled accumulator matmul)
# --------------------------------------------------------------------------
def adj_matmul_relu_kernel(adj_ref, h_ref, out_ref, acc_ref):
    k = pl.program_id(2)

    @pl.when(k == 0)
    def _():
        acc_ref[...] = jnp.zeros_like(acc_ref)

    acc_ref[...] += jnp.dot(
        adj_ref[...], h_ref[...], preferred_element_type=jnp.float32
    )

    @pl.when(k == pl.num_programs(2) - 1)
    def _():
        # ReLU applied only after the full contraction.
        out_ref[...] = jnp.maximum(acc_ref[...], 0.0).astype(out_ref.dtype)


def graph_convolution(x, weight, bias, adj):
    """Forward of GraphConvolution. Returns (relu(adj @ (x @ W.T + b)), adj)."""
    n, f_in = x.shape
    f_out = weight.shape[0]

    # ---- lane/sublane-friendly padded dims -------------------------------
    f_in_p = _round_up(f_in, 128)
    f_out_p = _round_up(f_out, 128)

    # adj tile sizes: 256 targets the 256x256 MXU on v6e/v7x and is a
    # multiple of the 128x128 MXU on v5e; small graphs collapse to one tile.
    if n <= 256:
        bm = bk = _round_up(n, 128)
    else:
        bm = bk = 256
    n_pad = _round_up(n, bm)

    bn = 256 if (f_out_p % 256 == 0) else 128  # lane-dense output tile

    # ---- zero-pad operands (padding contributes exact zeros) -------------
    x_p = jnp.zeros((n_pad, f_in_p), x.dtype).at[:n, :f_in].set(x)
    wt_p = (
        jnp.zeros((f_in_p, f_out_p), weight.dtype)
        .at[:f_in, :f_out]
        .set(weight.T)  # pre-transpose once in the wrapper (no in-kernel .T)
    )
    b_p = jnp.zeros((1, f_out_p), bias.dtype).at[0, :f_out].set(bias)
    adj_p = jnp.zeros((n_pad, n_pad), adj.dtype).at[:n, :n].set(adj)

    # ---- stage 1: hidden computed exactly once ---------------------------
    hidden = pl.pallas_call(
        linear_kernel,
        out_shape=jax.ShapeDtypeStruct((n_pad, f_out_p), jnp.float32),
        grid_spec=pltpu.PrefetchScalarGridSpec(
            num_scalar_prefetch=0,
            grid=(n_pad // bm,),
            in_specs=[
                pl.BlockSpec((bm, f_in_p), lambda i: (i, 0)),
                pl.BlockSpec((f_in_p, f_out_p), lambda i: (0, 0)),
                pl.BlockSpec((1, f_out_p), lambda i: (0, 0)),
            ],
            out_specs=pl.BlockSpec((bm, f_out_p), lambda i: (i, 0)),
        ),
        compiler_params=pltpu.CompilerParams(
            dimension_semantics=("parallel",),
        ),
        cost_estimate=pl.CostEstimate(
            flops=2 * n_pad * f_in_p * f_out_p,
            transcendentals=0,
            bytes_accessed=4 * (n_pad * f_in_p + f_in_p * f_out_p + n_pad * f_out_p),
        ),
    )(x_p, wt_p, b_p)

    # ---- stage 2: tiled adj @ hidden with ReLU epilogue -------------------
    grid = (n_pad // bm, f_out_p // bn, n_pad // bk)

    out_p = pl.pallas_call(
        adj_matmul_relu_kernel,
        out_shape=jax.ShapeDtypeStruct((n_pad, f_out_p), jnp.float32),
        grid_spec=pltpu.PrefetchScalarGridSpec(
            num_scalar_prefetch=0,
            grid=grid,
            in_specs=[
                pl.BlockSpec((bm, bk), lambda i, j, k: (i, k)),   # adj tile
                pl.BlockSpec((bk, bn), lambda i, j, k: (k, j)),   # hidden tile
            ],
            out_specs=pl.BlockSpec((bm, bn), lambda i, j, k: (i, j)),
            scratch_shapes=[pltpu.VMEM((bm, bn), jnp.float32)],
        ),
        compiler_params=pltpu.CompilerParams(
            dimension_semantics=("parallel", "parallel", "arbitrary"),
            vmem_limit_bytes=64 * 1024 * 1024,
        ),
        cost_estimate=pl.CostEstimate(
            flops=2 * n_pad * n_pad * f_out_p,
            transcendentals=0,
            bytes_accessed=4 * (n_pad * n_pad + 2 * n_pad * f_out_p),
        ),
    )(adj_p, hidden)

    out = out_p[:n, :f_out]
    return out, adj


def reference(x, weight, bias, adj):
    hidden = x @ weight.T + bias
    support = adj @ hidden
    return jnp.maximum(support, 0.0)


if __name__ == "__main__":
    key = jax.random.PRNGKey(0)
    k_x, k_adj, k_w, k_b = jax.random.split(key, 4)

    # Small but non-trivial: exercises padding + multi-step (2x1x2) grid.
    N = 300        # number of graph nodes
    F_IN = 48      # in_features
    F_OUT = 96     # out_features

    x = jax.random.normal(k_x, (N, F_IN), dtype=jnp.float32)

    # Dense symmetric-ish adjacency with self loops, row-normalized.
    a = (jax.random.uniform(k_adj, (N, N)) > 0.9).astype(jnp.float32)
    a = a + a.T + jnp.eye(N, dtype=jnp.float32)
    adj = a / jnp.sum(a, axis=1, keepdims=True)

    # Deterministic nn.Linear-style init (kaiming-uniform-ish bounds).
    bound_w = 1.0 / math.sqrt(F_IN)
    weight = jax.random.uniform(
        k_w, (F_OUT, F_IN), minval=-bound_w, maxval=bound_w, dtype=jnp.float32
    )
    bias = jax.random.uniform(
        k_b, (F_OUT,), minval=-bound_w, maxval=bound_w, dtype=jnp.float32
    )

    out, adj_out = graph_convolution(x, weight, bias, adj)
    out = jax.block_until_ready(out)

    ref = reference(x, weight, bias, adj)
    assert out.shape == (N, F_OUT)
    assert jnp.allclose(out, ref, atol=1e-4, rtol=1e-4), "mismatch vs reference"
    assert adj_out.shape == adj.shape

    print("KERNEL_OK")
</pallas_src>

<mosaic_0001>
module attributes {stable_mosaic.version = 11 : i64} {
  func.func @linear_kernel(%arg0: i32, %arg1: memref<256x128xf32, #tpu.memory_space<vmem>>, %arg2: memref<128x128xf32, #tpu.memory_space<vmem>>, %arg3: memref<1x128xf32, #tpu.memory_space<vmem>>, %arg4: memref<256x128xf32, #tpu.memory_space<vmem>>) attributes {dimension_semantics = [#tpu.dimension_semantics<parallel>], iteration_bounds = array<i64: 2>, scalar_prefetch = 0 : i64, scratch_operands = 0 : i64, tpu.core_type = #tpu.core_type<tc>, window_params = [{transform_indices = @transform_0, window_bounds = array<i64: 256, 128>}, {pipeline_mode = #tpu.pipeline_mode<synchronous>, transform_indices = @transform_1, window_bounds = array<i64: 128, 128>}, {pipeline_mode = #tpu.pipeline_mode<synchronous>, transform_indices = @transform_2, window_bounds = array<i64: 1, 128>}, {transform_indices = @transform_3, window_bounds = array<i64: 256, 128>}]} {
    %c0 = arith.constant 0 : index
    %c0_0 = arith.constant 0 : index
    %0 = vector.load %arg1[%c0, %c0_0] : memref<256x128xf32, #tpu.memory_space<vmem>>, vector<256x128xf32>
    %c0_1 = arith.constant 0 : index
    %c0_2 = arith.constant 0 : index
    %1 = vector.load %arg2[%c0_1, %c0_2] : memref<128x128xf32, #tpu.memory_space<vmem>>, vector<128x128xf32>
    %cst = arith.constant dense<0.000000e+00> : vector<256x128xf32>
    %2 = tpu.matmul %0, %1, %cst {dimension_numbers = #tpu.dot_dimension_numbers<[1], [0], [0], [1], [0, 0, 1, 1], [], []>} : vector<256x128xf32>, vector<128x128xf32>, vector<256x128xf32> -> vector<256x128xf32>
    %c0_3 = arith.constant 0 : index
    %c0_4 = arith.constant 0 : index
    %3 = vector.load %arg3[%c0_3, %c0_4] : memref<1x128xf32, #tpu.memory_space<vmem>>, vector<1x128xf32>
    %4 = vector.broadcast %3 : vector<1x128xf32> to vector<256x128xf32>
    %5 = arith.addf %2, %4 : vector<256x128xf32>
    %c0_5 = arith.constant 0 : index
    %c0_6 = arith.constant 0 : index
    %6 = vector.load %arg4[%c0_5, %c0_6] : memref<256x128xf32, #tpu.memory_space<vmem>>, vector<256x128xf32>
    tpu.vector_store %arg4[%c0_5, %c0_6], %5 {strides = array<i32>} : memref<256x128xf32, #tpu.memory_space<vmem>>, vector<256x128xf32>,
    return
  }
  func.func @transform_0(%arg0: i32) -> (i32, i32) {
    %c0_i32 = arith.constant 0 : i32
    %c0_i32_0 = arith.constant 0 : i32
    return %arg0, %c0_i32 : i32, i32
  }
  func.func @transform_1(%arg0: i32) -> (i32, i32) {
    %c0_i32 = arith.constant 0 : i32
    %c0_i32_0 = arith.constant 0 : i32
    %c0_i32_1 = arith.constant 0 : i32
    return %c0_i32, %c0_i32_0 : i32, i32
  }
  func.func @transform_2(%arg0: i32) -> (i32, i32) {
    %c0_i32 = arith.constant 0 : i32
    %c0_i32_0 = arith.constant 0 : i32
    %c0_i32_1 = arith.constant 0 : i32
    return %c0_i32, %c0_i32_0 : i32, i32
  }
  func.func @transform_3(%arg0: i32) -> (i32, i32) {
    %c0_i32 = arith.constant 0 : i32
    %c0_i32_0 = arith.constant 0 : i32
    return %arg0, %c0_i32 : i32, i32
  }
}

</mosaic_0001>

<bundles_post_ra>
// kernel: tpu_custom_call.1
= control target key start
LH: loop header
LB: loop body
LE: loop exit
PB: predicated region body
PF: predicated region fallthrough
CT: control target
= control target key end

     0   :  { %8 = vsyncpa [#allocation3], 0  ;;  %s1345_s0 = inlined_call_operand.hbm [shape: f32[512,128], index: 0, kind: input, shape index: {}]   ;;  %s1346_s1 = inlined_call_operand.hbm [shape: f32[128,128], index: 1, kind: input, shape index: {}]   ;;  %s1347_s2 = inlined_call_operand.vmem [shape: f32[1,128], index: 2, kind: input, shape index: {}]   ;;  %s1348_s3 = inlined_call_operand.hbm [shape: f32[512,128], index: 3, kind: output, shape index: {}]  }
   0x1   :  { %10 = vsyncpa [#allocation3 + $0x1], 0 }
   0x2   :  { %11 = vsyncpa [#allocation6], 0 }
   0x3   :  { %12 = vsyncpa [#allocation4], 0 }
   0x4   :  { %14 = vsyncpa [#allocation4 + $0x1], 0  ;;  %s1028_s12 = smov 0   ;;  %s1030_s13 = smov 0  }
   0x5   :  { %s1032_s14 = smov 0   ;;  %s1034_s15 = smov 0  }
   0x6 LB: > { %s1049_s16 = sadd.s32 4294967295, %s999_s15   ;;  %s615_s17 = sadd.s32 4294967294, %s999_s15   ;;  %s999_s15 = sphi %s1034_s15, %s1368_s15   ;;  %s995_s14 = sphi %s1032_s14, %s1367_s14   ;;  %s991_s13 = sphi %s1030_s13, %s1366_s13   ;;  %s987_s12 = sphi %s1028_s12, %s1365_s12  }
   0x7   : > { %p40_p0 = scmp.ne.s32.totalorder %s991_s13, %s987_s12  ;;  %p1349_p1 = scmp.eq.s32.totalorder %s1049_s16, 0 }
   0x8   : > { %p112_p3 = scmp.eq.s32.totalorder %s615_s17, 1  ;;  %p616_p5 = scmp.ge.s32.totalorder %s999_s15, 1 }
   0x9   : > { %p1058_p4 = por %p1349_p1, %p40_p0  ;;  %p119_p7 = scmp.lt.s32.totalorder %s999_s15, 3 }
   0xa   : > { %p1063_p6 = por %p112_p3, %p40_p0  ;;  %s1001_s21 = smov [#allocation5]  }
   0xb   : > { %s1352_s18 = scalar_select %p1058_p4, 1, 0 }
   0xc   : > { %s1353_s19 = scalar_select %p1063_p6, 1, 0 }
   0xd   : > { %p1068_p8 = pnand %p616_p5, %p119_p7  ;;  %s131_s22 = sshll.u32 %s1001_s21, 4  ;;  %s1072_s22 = int_to_ptr.vmem [resolvable:$true] %s131_s22 }
   0xe   : > { %s1084_s24 = sadd.s32 1, %s999_s15   ;;  %s27_s25 = sadd.s32 1, %s995_s14 }
   0xf   : > { %s1354_s20 = scalar_select %p1068_p8, 1, 0 }
  0x10   : > { %p818_p9 = pneg %p1068_p8  ;;  %s24_s26 = ssub.s32 %s999_s15, %s1084_s24 }
  0x11   : > { %s871_s29 = scalar_lea.hbm %s1346_s1, 2048 }
  0x12   : > { %p1079_p11 = pnand %p818_p9, %p1349_p1  ;;  %p872_p12 = scmp.ne.s32.totalorder %s1346_s1, %s871_s29 }
  0x13   : > { %p878_p5 = scmp.lt.u32.totalorder %s871_s29, %s1346_s1 }
  0x14   : > { %p873_p13 = pneg %p1079_p11 }
  0x16   : > { %p874_p0 = pnand %p873_p13, %p872_p12 }
  0x18   : > { %p875_p3 = pneg %p874_p0 }
  0x1a   : > { %p880_p7 = pnand %p878_p5, %p875_p3 }
  0x1c   : > { %883 = shalt.err (!%p880_p7)
}
  0x1d   : > { %s884_s7 = scalar_lea.vmem %s1072_s22, 2048  ;;  %p892_p2 = scmp.lt.s32.totalorder %s1072_s22, %s1072_s22 }
  0x1e   : > { %p885_p9 = scmp.ne.s32.totalorder %s1072_s22, %s884_s7  ;;  %p893_p6 = scmp.lt.s32.totalorder %s884_s7, %s884_s7 }
  0x20   : > { %p887_p10 = pnand %p885_p9, %p873_p13  ;;  %p894_p4 = por %p893_p6, %p892_p2 }
  0x22   : > { %p888_p1 = pneg %p887_p10 }
  0x24   : > { %p895_p8 = pnand %p894_p4, %p888_p1 }
  0x26   : > { %898 = shalt.err (!%p895_p8)
}
  0x27   : > { %s1002_s8 = smov 128   ;;  %s1003_s9 = smov 8  }
  0x28   : > { %821 = dma.hbm_to_vmem [thread:$0]  (!%p1079_p11), %s1346_s1, 2048, %s1072_s22, [#allocation6], %s1002_s8, %s1002_s8, %s1003_s9  }
  0x29   : > { %p25_p1 = scmp.eq.s32.totalorder %s24_s26, 0  ;;  %p34_p2 = scmp.ne.s32.totalorder %s995_s14, %s991_s13 }
  0x2a   : > { %p35_p4 = scmp.eq.s32.totalorder %s999_s15, 0  ;;  %p831_p6 = scmp.lt.s32.totalorder %s999_s15, 2 }
  0x2b   : > { %s1118_s17 = scalar_select %p25_p1, %s995_s14, %s27_s25  }
  0x2c   : > { %p36_p8 = por %p35_p4, %p34_p2  ;;  %p1356_p10 = scmp.eq.s32.totalorder %s1049_s16, 1 }
  0x2d   : > { %s148_s23 = sand.u32 1, %s995_s14   ;;  %s632_s27 = sshll.u32 %s999_s15, 12 }
  0x2e   : > { %p1122_p12 = por %p1356_p10, %p34_p2  ;;  %s619_s28 = sshll.u32 %s148_s23, 8 }
  0x2f   : > { %s1131_s4 = scalar_lea.hbm %s1345_s0, %s632_s27  ;;  %s152_s22 = scalar_lea.vmem [#allocation2], %s619_s28 }
  0x30   : > { %s159_s25 = sshll.u32 %s152_s22, 4  ;;  %p1133_p11 = pnand %p831_p6, %p36_p8  ;;  %s1137_s25 = int_to_ptr.vmem [resolvable:$true] %s159_s25 }
  0x31   : > { %s1139_s5 = scalar_lea.sflag [#allocation3], %s148_s23  ;;  %s899_s6 = scalar_lea.hbm %s1131_s4, 4096 }
  0x32   : > { %p900_p13 = scmp.ne.s32.totalorder %s1131_s4, %s899_s6  ;;  %p901_p0 = pneg %p1133_p11 }
  0x33   : > { %s904_s11 = scalar_lea.hbm %s1345_s0, 8192  ;;  %p905_p7 = scmp.lt.u32.totalorder %s1131_s4, %s1345_s0 }
  0x34   : > { %p902_p3 = pnand %p901_p0, %p900_p13  ;;  %p906_p9 = scmp.lt.u32.totalorder %s904_s11, %s899_s6 }
  0x35   : > { %p908_p2 = scmp.lt.u32.totalorder %s899_s6, %s1131_s4 }
  0x36   : > { %p903_p5 = pneg %p902_p3  ;;  %p907_p1 = por %p906_p9, %p905_p7 }
  0x38   : > { %p909_p4 = por %p908_p2, %p907_p1 }
  0x3a   : > { %p910_p6 = pnand %p909_p4, %p903_p5 }
  0x3c   : > { %913 = shalt.err (!%p910_p6)
}
  0x3d   : > { %s914_s23 = scalar_lea.vmem %s1137_s25, 4096  ;;  %s1004_s29 = smov [#allocation2]  }
  0x3e   : > { %p915_p8 = scmp.ne.s32.totalorder %s1137_s25, %s914_s23  ;;  %s919_s30 = sshll.u32 %s1004_s29, 4  ;;  %s920_s30 = int_to_ptr.vmem [resolvable:$false] %s919_s30 }
  0x3f   : > { %s921_s22 = scalar_lea.vmem %s920_s30, 8192  ;;  %p922_p3 = scmp.lt.s32.totalorder %s1137_s25, %s920_s30 }
  0x40   : > { %p917_p10 = pnand %p915_p8, %p901_p0  ;;  %p923_p7 = scmp.lt.s32.totalorder %s921_s22, %s914_s23 }
  0x42   : > { %p918_p13 = pneg %p917_p10  ;;  %p924_p9 = por %p923_p7, %p922_p3 }
  0x44   : > { %p925_p1 = pnand %p924_p9, %p918_p13 }
  0x46   : > { %928 = shalt.err (!%p925_p1)
}
  0x47   : > { %825 = dma.hbm_to_vmem [thread:$0]  (!%p1133_p11), %s1131_s4, 4096, %s1137_s25, %s1139_s5, %s1002_s8, %s1002_s8, %s1003_s9  }
  0x48   : > { %p1359_p0 = scmp.ne.s32.totalorder %s1354_s20, 0 }
  0x49   : > { %s1173_s6 = sand.u32 (!%p1359_p0), 1, %s991_s13   ;;  %p1360_p5 = scmp.ne.s32.totalorder (!%p1359_p0), %s1352_s18, 0 }
  0x4a   : > { %171 = sbr.rel (%p1359_p0) target bundleno = 378 (0x17a), region = 32  ;;  %s623_s7 = sshll.u32 (!%p1359_p0), %s1173_s6, 8 }
  0x4b   : > { %s174_s10 = scalar_lea.sflag (!%p1359_p0), [#allocation3], %s1173_s6  ;;  %s1179_s26 = scalar_lea.vmem (!%p1359_p0), [#allocation2], %s623_s7 }
  0x51   : > { %974 = dma.done.wait (%p1360_p5), %s174_s10, 4096  }
  0x52   : > { %976 = vsyncadd (%p1360_p5), %s174_s10, 4294963200  ;;  %p1361_p11 = scmp.eq.s32.totalorder %s1049_s16, 0 }
  0x54   : > { %978 = dma.done.wait (%p1361_p11), [#allocation6], 2048   ;;  %p1362_p2 = pmov %p1361_p11 }
  0x55   : > { %v238_v0 = vld [vmem:[#allocation5] sm:$0xff]  ;;  %v239_v1 = vld [vmem:[#allocation5 + $0x8] sm:$0xff]  ;;  %v240_v2 = vld [vmem:[#allocation5 + $0x10] sm:$0xff]  ;;  %s1232_s8 = scalar_lea.vmem [#allocation7], %s623_s7  ;;  %s633_s9 = sshll.u32 %s1049_s16, 12 }
  0x56   : > { %980 = vsyncadd (%p1362_p2), [#allocation6], 4294965248  ;;  %v762_v3 = vpack.c.bf16 %v239_v1, %v238_v0  ;;  %v241_v4 = vld [vmem:[#allocation5 + $0x18] sm:$0xff]  ;;  %v242_v6 = vld [vmem:[#allocation5 + $0x20] sm:$0xff]  ;;  %s532_s4 = sshll.u32 %s1232_s8, 4  ;;  %s1293_s5 = scalar_lea.hbm %s1348_s3, %s633_s9  ;;  %s1295_s4 = int_to_ptr.vmem [resolvable:$true] %s532_s4 }
  0x57   : > { %v766_v5 = vpack.c.bf16 %v241_v4, %v240_v2  ;;  %v243_v7 = vld [vmem:[#allocation5 + $0x28] sm:$0xff]  ;;  %v206_v9 = vld [vmem:[%s1179_s26] sm:$0xff]  ;;  %v244_v11 = vld [vmem:[#allocation5 + $0x30] sm:$0xff]  ;;  %s519_s11 = scalar_lea.sflag [#allocation4], %s1173_s6  ;;  %s929_s27 = scalar_lea.vmem %s1295_s4, 4096 }
  0x58   : > { %763 = vmatprep.subr.bf16.mxu0 %v762_v3  ;;  %794 = vmatprep.subr.bf16.mxu1 %v762_v3  ;;  %v770_v8 = vpack.c.bf16 %v243_v7, %v242_v6  ;;  %v222_v10 = vld [vmem:[%s1179_s26 + $0x80] sm:$0xff]  ;;  %v245_v12 = vld [vmem:[#allocation5 + $0x38] sm:$0xff]  ;;  %v247_v15 = vld [vmem:[#allocation5 + $0x48] sm:$0xff]  ;;  %p930_p4 = scmp.ne.s32.totalorder %s1295_s4, %s929_s27  ;;  %s1005_s28 = smov [#allocation7]  }
  0x59   : > { %765 = vmatpush3.bf16.msra.mxu0 %v762_v3  ;;  %802 = vmatpush3.bf16.msra.mxu1 %v762_v3  ;;  %v774_v13 = vpack.c.bf16 %v245_v12, %v244_v11  ;;  %v246_v14 = vld [vmem:[#allocation5 + $0x40] sm:$0xff]  ;;  %v248_v17 = vld [vmem:[#allocation5 + $0x50] sm:$0xff]  ;;  %v249_v18 = vld [vmem:[#allocation5 + $0x58] sm:$0xff]  ;;  %s933_s23 = sshll.u32 %s1005_s28, 4  ;;  %s934_s23 = int_to_ptr.vmem [resolvable:$false] %s933_s23 }
  0x5a   : > { %767 = vmatprep.subr.bf16.mxu0 %v766_v5  ;;  %795 = vmatprep.subr.bf16.mxu1 %v766_v5  ;;  %v778_v16 = vpack.c.bf16 %v247_v15, %v246_v14  ;;  %v782_v19 = vpack.c.bf16 %v249_v18, %v248_v17  ;;  %v250_v20 = vld [vmem:[#allocation5 + $0x60] sm:$0xff]  ;;  %v251_v21 = vld [vmem:[#allocation5 + $0x68] sm:$0xff]  ;;  %v252_v23 = vld [vmem:[#allocation5 + $0x70] sm:$0xff]  ;;  %p931_p6 = pnand %p930_p4, %p1122_p12  ;;  %s935_s29 = scalar_lea.vmem %s934_s23, 8192 }
  0x5b   : > { %714 = vmatprep.mubr.f32.mxu0 %v206_v9  ;;  %738 = vmatprep.mubr.f32.mxu1 %v222_v10  ;;  %v786_v22 = vpack.c.bf16 %v251_v21, %v250_v20  ;;  %v253_v24 = vld [vmem:[#allocation5 + $0x78] sm:$0xff]  ;;  %v207_v26 = vld [vmem:[%s1179_s26 + $0x8] sm:$0xff]  ;;  %v208_v28 = vld [vmem:[%s1179_s26 + $0x10] sm:$0xff]  ;;  %p936_p10 = scmp.lt.s32.totalorder %s1295_s4, %s934_s23  ;;  %p937_p13 = scmp.lt.s32.totalorder %s935_s29, %s929_s27 }
  0x5c   : > { %v790_v25 = vpack.c.bf16 %v253_v24, %v252_v23  ;;  %v223_v27 = vld [vmem:[%s1179_s26 + $0x88] sm:$0xff]  ;;  %v224_v29 = vld [vmem:[%s1179_s26 + $0x90] sm:$0xff]  ;;  %v209_v30 = vld [vmem:[%s1179_s26 + $0x18] sm:$0xff]  ;;  %p932_p8 = pneg %p931_p6 }
  0x5d   : > { %769 = vmatpush3.bf16.msra.mxu0 %v766_v5  ;;  %803 = vmatpush3.bf16.msra.mxu1 %v766_v5  ;;  %v225_v31 = vld [vmem:[%s1179_s26 + $0x98] sm:$0xff]  ;;  %v210_v32 = vld [vmem:[%s1179_s26 + $0x20] sm:$0xff]  ;;  %v211_v34 = vld [vmem:[%s1179_s26 + $0x28] sm:$0xff]  ;;  %p938_p3 = por %p937_p13, %p936_p10 }
  0x5e   : > { %771 = vmatprep.subr.bf16.mxu0 %v770_v8  ;;  %796 = vmatprep.subr.bf16.mxu1 %v770_v8  ;;  %v226_v33 = vld [vmem:[%s1179_s26 + $0xa0] sm:$0xff]  ;;  %v227_v35 = vld [vmem:[%s1179_s26 + $0xa8] sm:$0xff]  ;;  %v212_v36 = vld [vmem:[%s1179_s26 + $0x30] sm:$0xff] }
  0x5f   : > { %v228_v37 = vld [vmem:[%s1179_s26 + $0xb0] sm:$0xff]  ;;  %v213_v38 = vld [vmem:[%s1179_s26 + $0x38] sm:$0xff]  ;;  %v214_v40 = vld [vmem:[%s1179_s26 + $0x40] sm:$0xff]  ;;  %p939_p7 = pnand %p938_p3, %p932_p8 }
  0x60   : > { %v229_v39 = vld [vmem:[%s1179_s26 + $0xb8] sm:$0xff]  ;;  %v230_v41 = vld [vmem:[%s1179_s26 + $0xc0] sm:$0xff]  ;;  %v215_v42 = vld [vmem:[%s1179_s26 + $0x48] sm:$0xff] }
  0x61   : > { %773 = vmatpush3.bf16.msra.mxu0 %v770_v8  ;;  %804 = vmatpush3.bf16.msra.mxu1 %v770_v8  ;;  %v231_v43 = vld [vmem:[%s1179_s26 + $0xc8] sm:$0xff]  ;;  %v216_v44 = vld [vmem:[%s1179_s26 + $0x50] sm:$0xff]  ;;  %v217_v46 = vld [vmem:[%s1179_s26 + $0x58] sm:$0xff] }
  0x62   : > { %775 = vmatprep.subr.bf16.mxu0 %v774_v13  ;;  %797 = vmatprep.subr.bf16.mxu1 %v774_v13  ;;  %v232_v45 = vld [vmem:[%s1179_s26 + $0xd0] sm:$0xff]  ;;  %v233_v47 = vld [vmem:[%s1179_s26 + $0xd8] sm:$0xff]  ;;  %v218_v48 = vld [vmem:[%s1179_s26 + $0x60] sm:$0xff] }
  0x63   : > { %v234_v49 = vld [vmem:[%s1179_s26 + $0xe0] sm:$0xff]  ;;  %v219_v50 = vld [vmem:[%s1179_s26 + $0x68] sm:$0xff]  ;;  %v220_v52 = vld [vmem:[%s1179_s26 + $0x70] sm:$0xff] }
  0x64   : > { %v235_v51 = vld [vmem:[%s1179_s26 + $0xe8] sm:$0xff]  ;;  %v236_v53 = vld [vmem:[%s1179_s26 + $0xf0] sm:$0xff]  ;;  %v221_v54 = vld [vmem:[%s1179_s26 + $0x78] sm:$0xff] }
  0x65   : > { %777 = vmatpush3.bf16.msra.mxu0 %v774_v13  ;;  %805 = vmatpush3.bf16.msra.mxu1 %v774_v13  ;;  %v237_v55 = vld [vmem:[%s1179_s26 + $0xf8] sm:$0xff]  ;;  %v1224_v56 = vld [vmem:[%s1347_s2] ss:$0 sm:$0xff] }
  0x66   : > { %779 = vmatprep.subr.bf16.mxu0 %v778_v16  ;;  %798 = vmatprep.subr.bf16.mxu1 %v778_v16 }
  0x69   : > { %781 = vmatpush3.bf16.msra.mxu0 %v778_v16  ;;  %806 = vmatpush3.bf16.msra.mxu1 %v778_v16 }
  0x6a   : > { %783 = vmatprep.subr.bf16.mxu0 %v782_v19  ;;  %799 = vmatprep.subr.bf16.mxu1 %v782_v19 }
  0x6d   : > { %785 = vmatpush3.bf16.msra.mxu0 %v782_v19  ;;  %807 = vmatpush3.bf16.msra.mxu1 %v782_v19 }
  0x6e   : > { %787 = vmatprep.subr.bf16.mxu0 %v786_v22  ;;  %800 = vmatprep.subr.bf16.mxu1 %v786_v22 }
  0x71   : > { %789 = vmatpush3.bf16.msra.mxu0 %v786_v22  ;;  %808 = vmatpush3.bf16.msra.mxu1 %v786_v22 }
  0x72   : > { %791 = vmatprep.subr.bf16.mxu0 %v790_v25  ;;  %801 = vmatprep.subr.bf16.mxu1 %v790_v25 }
  0x75   : > { %793 = vmatpush3.bf16.msra.mxu0 %v790_v25  ;;  %809 = vmatpush3.bf16.msra.mxu1 %v790_v25 }
  0x78   : > { %715 = vmatmul.mubr.f32.vlgmr.msra.gmra.mrb[0].mxu0 %v207_v26  ;;  %739 = vmatmul.mubr.f32.vlgmr.msra.gmra.mrb[0].mxu1 %v223_v27 }
  0x79   : > { %717 = vmatprep.mubr.f32.mxu0 %v208_v28  ;;  %741 = vmatprep.mubr.f32.mxu1 %v224_v29 }
  0x7c   : > { %718 = vmatmul.mubr.f32.gmra.mrb[2].mxu0 %v209_v30  ;;  %742 = vmatmul.mubr.f32.gmra.mrb[2].mxu1 %v225_v31 }
  0x7d   : > { %720 = vmatprep.mubr.f32.mxu0 %v210_v32  ;;  %744 = vmatprep.mubr.f32.mxu1 %v226_v33 }
  0x80   : > { %721 = vmatmul.mubr.f32.gmra.mrb[4].mxu0 %v211_v34  ;;  %745 = vmatmul.mubr.f32.gmra.mrb[4].mxu1 %v227_v35 }
  0x81   : > { %723 = vmatprep.mubr.f32.mxu0 %v212_v36  ;;  %747 = vmatprep.mubr.f32.mxu1 %v228_v37 }
  0x84   : > { %724 = vmatmul.mubr.f32.gmra.mrb[6].mxu0 %v213_v38  ;;  %748 = vmatmul.mubr.f32.gmra.mrb[6].mxu1 %v229_v39 }
  0x85   : > { %726 = vmatprep.mubr.f32.mxu0 %v214_v40  ;;  %750 = vmatprep.mubr.f32.mxu1 %v230_v41 }
  0x88   : > { %727 = vmatmul.mubr.f32.gmra.mrb[8].mxu0 %v215_v42  ;;  %751 = vmatmul.mubr.f32.gmra.mrb[8].mxu1 %v231_v43 }
  0x89   : > { %729 = vmatprep.mubr.f32.mxu0 %v216_v44  ;;  %753 = vmatprep.mubr.f32.mxu1 %v232_v45 }
  0x8c   : > { %730 = vmatmul.mubr.f32.gmra.mrb[10].mxu0 %v217_v46  ;;  %754 = vmatmul.mubr.f32.gmra.mrb[10].mxu1 %v233_v47 }
  0x8d   : > { %732 = vmatprep.mubr.f32.mxu0 %v218_v48  ;;  %756 = vmatprep.mubr.f32.mxu1 %v234_v49 }
  0x90   : > { %733 = vmatmul.mubr.f32.gmra.mrb[12].mxu0 %v219_v50  ;;  %757 = vmatmul.mubr.f32.gmra.mrb[12].mxu1 %v235_v51 }
  0x91   : > { %735 = vmatprep.mubr.f32.mxu0 %v220_v52  ;;  %759 = vmatprep.mubr.f32.mxu1 %v236_v53 }
  0x94   : > { %736 = vmatmul.mubr.f32.gmra.mrb[14].mxu0 %v221_v54  ;;  %760 = vmatmul.mubr.f32.gmra.mrb[14].mxu1 %v237_v55 }
 0x14b   : > { %v716_v57 = vpop.f32.mrb[0].mxu0  ;;  %v740_v58 = vpop.f32.mrb[0].mxu1 }
 0x14c   : > { %v333_v59 = vadd.f32 %v716_v57, %v1224_v56  ;;  %v413_v60 = vadd.f32 %v740_v58, %v1224_v56  ;;  %v327_v61 = vpop.f32.mrb[1].mxu0  ;;  %v407_v62 = vpop.f32.mrb[1].mxu1 }
 0x14d   : > { %v328_v63 = vadd.f32 %v1224_v56, %v327_v61  ;;  %v408_v0 = vadd.f32 %v1224_v56, %v407_v62 }
 0x14e   : > { %487 = vst [vmem:[%s1232_s8 + $0x8] sm:$0xff] %v333_v59  ;;  %503 = vst [vmem:[%s1232_s8 + $0x88] sm:$0xff] %v413_v60 }
 0x14f   : > { %486 = vst [vmem:[%s1232_s8] sm:$0xff] %v328_v63  ;;  %502 = vst [vmem:[%s1232_s8 + $0x80] sm:$0xff] %v408_v0  ;;  %v719_v1 = vpop.f32.mrb[2].mxu0  ;;  %v743_v2 = vpop.f32.mrb[2].mxu1 }
 0x150   : > { %v343_v3 = vadd.f32 %v719_v1, %v1224_v56  ;;  %v423_v4 = vadd.f32 %v743_v2, %v1224_v56  ;;  %v337_v5 = vpop.f32.mrb[3].mxu0  ;;  %v417_v6 = vpop.f32.mrb[3].mxu1 }
 0x151   : > { %v338_v7 = vadd.f32 %v1224_v56, %v337_v5  ;;  %v418_v8 = vadd.f32 %v1224_v56, %v417_v6 }
 0x152   : > { %489 = vst [vmem:[%s1232_s8 + $0x18] sm:$0xff] %v343_v3  ;;  %505 = vst [vmem:[%s1232_s8 + $0x98] sm:$0xff] %v423_v4 }
 0x153   : > { %488 = vst [vmem:[%s1232_s8 + $0x10] sm:$0xff] %v338_v7  ;;  %504 = vst [vmem:[%s1232_s8 + $0x90] sm:$0xff] %v418_v8  ;;  %v722_v9 = vpop.f32.mrb[4].mxu0  ;;  %v746_v10 = vpop.f32.mrb[4].mxu1 }
 0x154   : > { %v353_v11 = vadd.f32 %v722_v9, %v1224_v56  ;;  %v433_v12 = vadd.f32 %v746_v10, %v1224_v56  ;;  %v347_v13 = vpop.f32.mrb[5].mxu0  ;;  %v427_v14 = vpop.f32.mrb[5].mxu1 }
 0x155   : > { %v348_v15 = vadd.f32 %v1224_v56, %v347_v13  ;;  %v428_v16 = vadd.f32 %v1224_v56, %v427_v14 }
 0x156   : > { %491 = vst [vmem:[%s1232_s8 + $0x28] sm:$0xff] %v353_v11  ;;  %507 = vst [vmem:[%s1232_s8 + $0xa8] sm:$0xff] %v433_v12 }
 0x157   : > { %490 = vst [vmem:[%s1232_s8 + $0x20] sm:$0xff] %v348_v15  ;;  %506 = vst [vmem:[%s1232_s8 + $0xa0] sm:$0xff] %v428_v16  ;;  %v725_v17 = vpop.f32.mrb[6].mxu0  ;;  %v749_v18 = vpop.f32.mrb[6].mxu1 }
 0x158   : > { %v363_v19 = vadd.f32 %v725_v17, %v1224_v56  ;;  %v443_v20 = vadd.f32 %v749_v18, %v1224_v56  ;;  %v357_v21 = vpop.f32.mrb[7].mxu0  ;;  %v437_v22 = vpop.f32.mrb[7].mxu1 }
 0x159   : > { %v358_v23 = vadd.f32 %v1224_v56, %v357_v21  ;;  %v438_v24 = vadd.f32 %v1224_v56, %v437_v22 }
 0x15a   : > { %493 = vst [vmem:[%s1232_s8 + $0x38] sm:$0xff] %v363_v19  ;;  %509 = vst [vmem:[%s1232_s8 + $0xb8] sm:$0xff] %v443_v20 }
 0x15b   : > { %492 = vst [vmem:[%s1232_s8 + $0x30] sm:$0xff] %v358_v23  ;;  %508 = vst [vmem:[%s1232_s8 + $0xb0] sm:$0xff] %v438_v24  ;;  %v728_v25 = vpop.f32.mrb[8].mxu0  ;;  %v752_v26 = vpop.f32.mrb[8].mxu1 }
 0x15c   : > { %v373_v27 = vadd.f32 %v728_v25, %v1224_v56  ;;  %v453_v28 = vadd.f32 %v752_v26, %v1224_v56  ;;  %v367_v29 = vpop.f32.mrb[9].mxu0  ;;  %v447_v30 = vpop.f32.mrb[9].mxu1 }
 0x15d   : > { %v368_v31 = vadd.f32 %v1224_v56, %v367_v29  ;;  %v448_v32 = vadd.f32 %v1224_v56, %v447_v30 }
 0x15e   : > { %495 = vst [vmem:[%s1232_s8 + $0x48] sm:$0xff] %v373_v27  ;;  %511 = vst [vmem:[%s1232_s8 + $0xc8] sm:$0xff] %v453_v28 }
 0x15f   : > { %494 = vst [vmem:[%s1232_s8 + $0x40] sm:$0xff] %v368_v31  ;;  %510 = vst [vmem:[%s1232_s8 + $0xc0] sm:$0xff] %v448_v32  ;;  %v731_v33 = vpop.f32.mrb[10].mxu0  ;;  %v755_v34 = vpop.f32.mrb[10].mxu1 }
 0x160   : > { %v383_v35 = vadd.f32 %v731_v33, %v1224_v56  ;;  %v463_v36 = vadd.f32 %v755_v34, %v1224_v56  ;;  %v377_v37 = vpop.f32.mrb[11].mxu0  ;;  %v457_v38 = vpop.f32.mrb[11].mxu1 }
 0x161   : > { %v378_v39 = vadd.f32 %v1224_v56, %v377_v37  ;;  %v458_v40 = vadd.f32 %v1224_v56, %v457_v38 }
 0x162   : > { %497 = vst [vmem:[%s1232_s8 + $0x58] sm:$0xff] %v383_v35  ;;  %513 = vst [vmem:[%s1232_s8 + $0xd8] sm:$0xff] %v463_v36 }
 0x163   : > { %496 = vst [vmem:[%s1232_s8 + $0x50] sm:$0xff] %v378_v39  ;;  %512 = vst [vmem:[%s1232_s8 + $0xd0] sm:$0xff] %v458_v40  ;;  %v734_v41 = vpop.f32.mrb[12].mxu0  ;;  %v758_v42 = vpop.f32.mrb[12].mxu1 }
 0x164   : > { %v393_v43 = vadd.f32 %v734_v41, %v1224_v56  ;;  %v473_v44 = vadd.f32 %v758_v42, %v1224_v56  ;;  %v387_v45 = vpop.f32.mrb[13].mxu0  ;;  %v467_v46 = vpop.f32.mrb[13].mxu1 }
 0x165   : > { %v388_v47 = vadd.f32 %v1224_v56, %v387_v45  ;;  %v468_v48 = vadd.f32 %v1224_v56, %v467_v46 }
 0x166   : > { %499 = vst [vmem:[%s1232_s8 + $0x68] sm:$0xff] %v393_v43  ;;  %515 = vst [vmem:[%s1232_s8 + $0xe8] sm:$0xff] %v473_v44 }
 0x167   : > { %498 = vst [vmem:[%s1232_s8 + $0x60] sm:$0xff] %v388_v47  ;;  %514 = vst [vmem:[%s1232_s8 + $0xe0] sm:$0xff] %v468_v48  ;;  %v737_v49 = vpop.f32.mrb[14].mxu0  ;;  %v761_v50 = vpop.f32.mrb[14].mxu1 }
 0x168   : > { %v403_v51 = vadd.f32 %v737_v49, %v1224_v56  ;;  %v483_v52 = vadd.f32 %v761_v50, %v1224_v56  ;;  %v397_v53 = vpop.f32.mrb[15].mxu0  ;;  %v477_v54 = vpop.f32.mrb[15].mxu1 }
 0x169   : > { %v398_v55 = vadd.f32 %v1224_v56, %v397_v53  ;;  %v478_v57 = vadd.f32 %v1224_v56, %v477_v54 }
 0x16a   : > { %501 = vst [vmem:[%s1232_s8 + $0x78] sm:$0xff] %v403_v51  ;;  %517 = vst [vmem:[%s1232_s8 + $0xf8] sm:$0xff] %v483_v52 }
 0x16b   : > { %500 = vst [vmem:[%s1232_s8 + $0x70] sm:$0xff] %v398_v55  ;;  %516 = vst [vmem:[%s1232_s8 + $0xf0] sm:$0xff] %v478_v57 }
 0x16c   : > { %942 = shalt.err (!%p939_p7)
}
 0x16d   : > { %s943_s30 = scalar_lea.hbm %s1293_s5, 4096  ;;  %s947_s10 = scalar_lea.hbm %s1348_s3, 8192 }
 0x16e   : > { %p944_p9 = scmp.ne.s32.totalorder %s1293_s5, %s943_s30  ;;  %p948_p5 = scmp.lt.u32.totalorder %s1293_s5, %s1348_s3 }
 0x16f   : > { %p949_p11 = scmp.lt.u32.totalorder %s947_s10, %s943_s30  ;;  %p951_p4 = scmp.lt.u32.totalorder %s943_s30, %s1293_s5 }
 0x170   : > { %p945_p1 = pnand %p944_p9, %p1122_p12 }
 0x171   : > { %p950_p2 = por %p949_p11, %p948_p5 }
 0x172   : > { %p946_p0 = pneg %p945_p1 }
 0x173   : > { %p952_p6 = por %p951_p4, %p950_p2 }
 0x175   : > { %p953_p8 = pnand %p952_p6, %p946_p0 }
 0x177   : > { %956 = shalt.err (!%p953_p8)
}
 0x178   : > { %s1006_s20 = smov 128   ;;  %s1007_s8 = smov 8  }
 0x179   : > { %816 = dma.vmem_to_hbm [thread:$0]  (%p1122_p12), %s1295_s4, 4096, %s1293_s5, %s519_s11, %s1006_s20, %s1006_s20, %s1007_s8  }
 0x17a PF: > { %s547_s9 = sand.u32 1, %s987_s12   ;;  %p1363_p10 = scmp.ne.s32.totalorder %s1353_s19, 0 }
 0x17b   : > { %p1364_p13 = scmp.ge.s32.totalorder %s999_s15, 2  ;;  %s548_s16 = scalar_lea.sflag [#allocation4], %s547_s9 }
 0x17d   : > { %p827_p3 = pnand %p1364_p13, %p1363_p10 }
 0x17f   : > { %982 = dma.done.wait (!%p827_p3), %s548_s16, 4096  }
 0x180   : > { %984 = vsyncadd (!%p827_p3), %s548_s16, 4294963200  ;;  %p17_p7 = scmp.ge.s32.totalorder %s1084_s24, 4   ;;  %s1365_s12 = smov %s991_s13 }
 0x181   : > { %s1366_s13 = smov %s995_s14  ;;  %s1367_s14 = smov %s1118_s17 }
 0x182   : > { %s1368_s15 = smov %s1084_s24  ;;  %19 = sbr.rel (!%p17_p7) target bundleno = 6 (0x6), region = 81 }
 0x189   :  { %553 = vsyncpa [#allocation3], 1 }
 0x18a   :  { %555 = vsyncpa [#allocation3 + $0x1], 1 }
 0x18b   :  { %556 = vsyncpa [#allocation6], 1 }
 0x18c   :  { %557 = vsyncpa [#allocation4], 1 }
 0x18d   :  { %559 = vsyncpa [#allocation4 + $0x1], 1 }

</bundles_post_ra>
